<compile_context>
chip_gen: v7x
topology: tpu7x:2x2x1
jax: 0.10.0
libtpu: 0.0.40
codegen_flags: <defaults>
</compile_context>

<pallas_src>
import numpy as np

import jax
import jax.numpy as jnp
from jax.experimental import pallas as pl
from jax.experimental.pallas import tpu as pltpu

_LANE = 128
_MAX_DMA_CHUNKS = 4   # >= 2 concurrent DMAs helps v7x; 4 is plenty for a memcpy
_ROW_ALIGN = 8        # chunk boundaries on 8-row (sublane-tile) multiples


def _dma_copy_kernel(x_hbm, o_hbm, sems):
    """Copy x_hbm -> o_hbm with a few concurrent whole-slab HBM->HBM DMAs."""
    rows = x_hbm.shape[0]
    # Trace-time chunking (shapes are static): ceil(rows / _MAX_DMA_CHUNKS),
    # rounded up to an 8-row boundary so every chunk start is tile-aligned.
    chunk = -(-rows // _MAX_DMA_CHUNKS)
    chunk = -(-chunk // _ROW_ALIGN) * _ROW_ALIGN
    chunk = max(min(chunk, rows), 1)

    copies = []
    start = 0
    idx = 0
    while start < rows:           # trace-time loop, <= _MAX_DMA_CHUNKS iters
        size = min(chunk, rows - start)
        cp = pltpu.make_async_copy(
            x_hbm.at[pl.ds(start, size), :],
            o_hbm.at[pl.ds(start, size), :],
            sems.at[idx],
        )
        cp.start()
        copies.append(cp)
        start += size
        idx += 1
    for cp in copies:
        cp.wait()


def _pallas_fresh_copy(x):
    """Bit-exact copy of `x` into a new HBM buffer via HBM->HBM DMA."""
    shape = x.shape
    total = int(x.size)
    itemsize = x.dtype.itemsize

    if total % _LANE == 0 and total >= _LANE:
        # Common case: zero-copy reshape to a lane-dense [rows, 128] slab and
        # chunk along rows (up to _MAX_DMA_CHUNKS concurrent DMAs).
        x2d = jnp.reshape(x, (total // _LANE, _LANE))
    else:
        # Ragged / tiny totals: copy as a single (1, total) slab (one DMA) --
        # no padding and no slice-back.
        x2d = jnp.reshape(x, (1, total))

    y2d = pl.pallas_call(
        _dma_copy_kernel,
        out_shape=jax.ShapeDtypeStruct(x2d.shape, x2d.dtype),
        in_specs=[pl.BlockSpec(memory_space=pl.ANY)],
        out_specs=pl.BlockSpec(memory_space=pl.ANY),
        scratch_shapes=[pltpu.SemaphoreType.DMA((_MAX_DMA_CHUNKS,))],
        cost_estimate=pl.CostEstimate(
            flops=0, transcendentals=0, bytes_accessed=2 * total * itemsize),
    )(x2d)
    return jnp.reshape(y2d, shape)


def asymmetric_feedback_forward(x, *, force_copy=False):
    """JAX/Pallas equivalent of AsymmetricFeedback.forward (PyTorch .detach()).

    Default (force_copy=False): exact detach semantics -- identical values,
    gradients blocked, storage shared with the input.  No kernel launch and no
    HBM traffic (the dominant optimization for this purely memory-bound op).

    force_copy=True: additionally materialize the result in a fresh HBM buffer
    via the Pallas HBM->HBM DMA copy kernel (detach().clone()-like).
    """
    # TODO(synk): output.requires_grad = True has no JAX analog; downstream ops
    # are differentiable w.r.t. the returned array by default.
    x = jax.lax.stop_gradient(x)   # detach: block grads into the upstream graph
    if not force_copy or x.size == 0:
        return x
    return _pallas_fresh_copy(x)


if __name__ == "__main__":
    key = jax.random.PRNGKey(0)
    # Module has no parameters (self.rp = None), so no weight init is needed.
    x = jax.random.normal(key, (2, 4, 16, 16), dtype=jnp.float32)  # NCHW
    x_host = np.asarray(x)

    # Default path: pure detach (shared storage, no kernel -- matches PyTorch).
    y = jax.block_until_ready(asymmetric_feedback_forward(x))
    assert y.shape == x_host.shape and y.dtype == x_host.dtype
    assert np.array_equal(np.asarray(y), x_host)

    # detach semantics: gradients do not flow back through the op.
    g = jax.grad(lambda v: jnp.sum(asymmetric_feedback_forward(v) ** 2))(x)
    assert np.array_equal(np.asarray(g), np.zeros_like(x_host))

    # Fresh-buffer path: exercises the Pallas HBM->HBM DMA copy kernel
    # (2048 elems -> [16, 128] slab -> two 8-row DMA chunks).
    y_copy = jax.block_until_ready(asymmetric_feedback_forward(x, force_copy=True))
    assert y_copy.shape == x_host.shape and y_copy.dtype == x_host.dtype
    assert np.array_equal(np.asarray(y_copy), x_host)

    # Also exercise the ragged-total (1, total) single-DMA path.
    x_odd = jax.random.normal(jax.random.PRNGKey(0), (3, 5, 7), dtype=jnp.float32)
    y_odd = jax.block_until_ready(asymmetric_feedback_forward(x_odd, force_copy=True))
    assert np.array_equal(np.asarray(y_odd), np.asarray(x_odd))

    print("KERNEL_OK")
</pallas_src>

<mosaic_0001>
module attributes {stable_mosaic.version = 11 : i64} {
  func.func @_dma_copy_kernel(%arg0: memref<16x128xf32, #tpu.memory_space<any>>, %arg1: memref<16x128xf32, #tpu.memory_space<any>>, %arg2: memref<4x!tpu.dma_semaphore, #tpu.memory_space<semaphore_mem>>) attributes {dimension_semantics = [], scalar_prefetch = 0 : i64, scratch_operands = 1 : i64, tpu.core_type = #tpu.core_type<tc>} {
    %c0_i32 = arith.constant 0 : i32
    %c0_i32_0 = arith.constant 0 : i32
    %c0_i32_1 = arith.constant 0 : i32
    %0 = tpu.memref_slice %arg0[%c0_i32_0, %c0_i32_1] : memref<16x128xf32, #tpu.memory_space<any>> -> memref<8x128xf32, #tpu.memory_space<any>>
    %c0_i32_2 = arith.constant 0 : i32
    %c0_i32_3 = arith.constant 0 : i32
    %1 = tpu.memref_slice %arg1[%c0_i32_2, %c0_i32_3] : memref<16x128xf32, #tpu.memory_space<any>> -> memref<8x128xf32, #tpu.memory_space<any>>
    %2 = tpu.memref_slice %arg2[%c0_i32] : memref<4x!tpu.dma_semaphore, #tpu.memory_space<semaphore_mem>> -> memref<1x!tpu.dma_semaphore, #tpu.memory_space<semaphore_mem>>
    %3 = tpu.memref_squeeze %2 : memref<1x!tpu.dma_semaphore, #tpu.memory_space<semaphore_mem>> -> memref<!tpu.dma_semaphore, #tpu.memory_space<semaphore_mem>>
    tpu.enqueue_dma source(%0 : memref<8x128xf32, #tpu.memory_space<any>>) target(%1 : memref<8x128xf32, #tpu.memory_space<any>>) target_semaphore(%3 : memref<!tpu.dma_semaphore, #tpu.memory_space<semaphore_mem>>)
    %c1_i32 = arith.constant 1 : i32
    %c8_i32 = arith.constant 8 : i32
    %c0_i32_4 = arith.constant 0 : i32
    %4 = tpu.memref_slice %arg0[%c8_i32, %c0_i32_4] : memref<16x128xf32, #tpu.memory_space<any>> -> memref<8x128xf32, #tpu.memory_space<any>>
    %c8_i32_5 = arith.constant 8 : i32
    %c0_i32_6 = arith.constant 0 : i32
    %5 = tpu.memref_slice %arg1[%c8_i32_5, %c0_i32_6] : memref<16x128xf32, #tpu.memory_space<any>> -> memref<8x128xf32, #tpu.memory_space<any>>
    %6 = tpu.memref_slice %arg2[%c1_i32] : memref<4x!tpu.dma_semaphore, #tpu.memory_space<semaphore_mem>> -> memref<1x!tpu.dma_semaphore, #tpu.memory_space<semaphore_mem>>
    %7 = tpu.memref_squeeze %6 : memref<1x!tpu.dma_semaphore, #tpu.memory_space<semaphore_mem>> -> memref<!tpu.dma_semaphore, #tpu.memory_space<semaphore_mem>>
    tpu.enqueue_dma source(%4 : memref<8x128xf32, #tpu.memory_space<any>>) target(%5 : memref<8x128xf32, #tpu.memory_space<any>>) target_semaphore(%7 : memref<!tpu.dma_semaphore, #tpu.memory_space<semaphore_mem>>)
    %c0_i32_7 = arith.constant 0 : i32
    %c0_i32_8 = arith.constant 0 : i32
    %c0_i32_9 = arith.constant 0 : i32
    %8 = tpu.memref_slice %arg0[%c0_i32_8, %c0_i32_9] : memref<16x128xf32, #tpu.memory_space<any>> -> memref<8x128xf32, #tpu.memory_space<any>>
    %c0_i32_10 = arith.constant 0 : i32
    %c0_i32_11 = arith.constant 0 : i32
    %9 = tpu.memref_slice %arg1[%c0_i32_10, %c0_i32_11] : memref<16x128xf32, #tpu.memory_space<any>> -> memref<8x128xf32, #tpu.memory_space<any>>
    %10 = tpu.memref_slice %arg2[%c0_i32_7] : memref<4x!tpu.dma_semaphore, #tpu.memory_space<semaphore_mem>> -> memref<1x!tpu.dma_semaphore, #tpu.memory_space<semaphore_mem>>
    %11 = tpu.memref_squeeze %10 : memref<1x!tpu.dma_semaphore, #tpu.memory_space<semaphore_mem>> -> memref<!tpu.dma_semaphore, #tpu.memory_space<semaphore_mem>>
    tpu.wait_dma2 semaphore(%11 : memref<!tpu.dma_semaphore, #tpu.memory_space<semaphore_mem>>) src(%8 : memref<8x128xf32, #tpu.memory_space<any>>) dst(%9 : memref<8x128xf32, #tpu.memory_space<any>>)
    %c1_i32_12 = arith.constant 1 : i32
    %c8_i32_13 = arith.constant 8 : i32
    %c0_i32_14 = arith.constant 0 : i32
    %12 = tpu.memref_slice %arg0[%c8_i32_13, %c0_i32_14] : memref<16x128xf32, #tpu.memory_space<any>> -> memref<8x128xf32, #tpu.memory_space<any>>
    %c8_i32_15 = arith.constant 8 : i32
    %c0_i32_16 = arith.constant 0 : i32
    %13 = tpu.memref_slice %arg1[%c8_i32_15, %c0_i32_16] : memref<16x128xf32, #tpu.memory_space<any>> -> memref<8x128xf32, #tpu.memory_space<any>>
    %14 = tpu.memref_slice %arg2[%c1_i32_12] : memref<4x!tpu.dma_semaphore, #tpu.memory_space<semaphore_mem>> -> memref<1x!tpu.dma_semaphore, #tpu.memory_space<semaphore_mem>>
    %15 = tpu.memref_squeeze %14 : memref<1x!tpu.dma_semaphore, #tpu.memory_space<semaphore_mem>> -> memref<!tpu.dma_semaphore, #tpu.memory_space<semaphore_mem>>
    tpu.wait_dma2 semaphore(%15 : memref<!tpu.dma_semaphore, #tpu.memory_space<semaphore_mem>>) src(%12 : memref<8x128xf32, #tpu.memory_space<any>>) dst(%13 : memref<8x128xf32, #tpu.memory_space<any>>)
    return
  }
}

</mosaic_0001>

<bundles_post_ra>
// kernel: tpu_custom_call.1
= control target key start
LH: loop header
LB: loop body
LE: loop exit
PB: predicated region body
PF: predicated region fallthrough
CT: control target
= control target key end

     0   :  { %s80_s9 = smov [#allocation2]   ;;  %s81_s10 = smov [#allocation3]   ;;  %s107_s0 = inlined_call_operand.hbm [shape: f32[16,128], index: 0, kind: input, shape index: {}]   ;;  %s108_s1 = inlined_call_operand.hbm [shape: f32[16,128], index: 1, kind: output, shape index: {}]  }
   0x1   :  { %s19_s8 = scalar_lea.hbm %s107_s0, 128  ;;  %s82_s11 = smov 0  }
   0x2   :  { %18 = dma.general %s107_s0, 128, %s108_s1, %s80_s9, %s81_s10, [#allocation4], %s82_s11, 0  }
   0x3   :  { %s20_s18 = scalar_lea.hbm %s108_s1, 128  ;;  %s83_s19 = smov [#allocation2 + $0x1]  }
   0x4   :  { %s84_s20 = smov [#allocation5]  }
   0x5   :  { %34 = dma.general %s19_s8, 128, %s20_s18, %s83_s19, %s84_s20, [#allocation6], %s82_s11, 0  }
   0x6   :  { %76 = dma.done.wait [#allocation2], 128 }
   0x7   :  { %77 = vsyncadd [#allocation2], 4294967168 }
   0x8   :  { %78 = dma.done.wait [#allocation2 + $0x1], 128 }
   0x9   :  { %79 = vsyncadd [#allocation2 + $0x1], 4294967168 }
   0xa   :  { %40 = vsyncmov [#allocation2] }
   0xd   :  { %s41_s21 = vpop.sfrf %40 }
   0xe   :  { %p67_p0 = scmp.ne.s32.totalorder %s41_s21, 0 }
  0x10   :  { %45 = shalt.err (%p67_p0)  }
  0x11   :  { %47 = vsyncmov [#allocation2 + $0x1] }
  0x14   :  { %s48_s22 = vpop.sfrf %47 }
  0x15   :  { %p68_p1 = scmp.ne.s32.totalorder %s48_s22, 0 }
  0x17   :  { %52 = shalt.err (%p68_p1)  }
  0x18   :  { %54 = vsyncmov [#allocation2 + $0x2] }
  0x1b   :  { %s55_s0 = vpop.sfrf %54 }
  0x1c   :  { %p69_p2 = scmp.ne.s32.totalorder %s55_s0, 0 }
  0x1e   :  { %59 = shalt.err (%p69_p2)  }
  0x1f   :  { %61 = vsyncmov [#allocation2 + $0x3] }
  0x22   :  { %s62_s1 = vpop.sfrf %61 }
  0x23   :  { %p70_p3 = scmp.ne.s32.totalorder %s62_s1, 0 }
  0x25   :  { %66 = shalt.err (%p70_p3)  }

</bundles_post_ra>
